<compile_context>
chip_gen: v5e
topology: v5e:2x2
jax: 0.10.0
libtpu: 0.0.40
codegen_flags: <defaults>
</compile_context>

<pallas_src>
import functools

import jax
import jax.numpy as jnp
from jax.experimental import pallas as pl
from jax.experimental.pallas import tpu as pltpu


def _round_up(x, m):
    return ((x + m - 1) // m) * m


def _head_kernel(x_ref, w0_ref, b0_ref, w1_ref, b1_ref, w2_ref, b2_ref, o_ref,
                 *, bf16_elementwise):
    x = x_ref[...]                                                    # (TB, H) bf16
    # dense: bf16 MXU, f32 accumulate; bias-add in f32.
    h = jnp.dot(x, w0_ref[...], preferred_element_type=jnp.float32)  # (TB, H) f32
    h = h + b0_ref[...]
    if bf16_elementwise:        # v6e/v7x: native bf16 EUP tanh
        h = jnp.tanh(h.astype(jnp.bfloat16))
    else:                       # v5e: no bf16 VPU/EUP -> keep tanh in f32
        h = jnp.tanh(h).astype(jnp.bfloat16)
    # dense_1
    h = jnp.dot(h, w1_ref[...], preferred_element_type=jnp.float32)  # (TB, 256) f32
    h = h + b1_ref[...]
    if bf16_elementwise:
        h = jnp.tanh(h.astype(jnp.bfloat16))
    else:
        h = jnp.tanh(h).astype(jnp.bfloat16)
    # out_proj (output dim padded to a lane-dense multiple of 128)
    out = jnp.dot(h, w2_ref[...], preferred_element_type=jnp.float32)  # (TB, LPAD)
    o_ref[...] = (out + b2_ref[...]).astype(o_ref.dtype)


def prepare_head_params(params):
    """One-time conversion of f32 Linear params to the kernel layout.

    Weights -> bf16 (halves weight DMA bytes, 2x MXU rate); out_proj weight and
    bias are padded to a lane-dense multiple of 128.  Call this ONCE (outside
    the per-step forward) and reuse the result, so the hot path never re-casts
    or re-pads multi-MiB weight tensors.
    """
    w2 = params["w2"]
    b2 = params["b2"]
    num_labels = w2.shape[1]
    lpad = _round_up(num_labels, 128)
    if lpad != num_labels:
        w2 = jnp.pad(w2, ((0, 0), (0, lpad - num_labels)))
        b2 = jnp.pad(b2, ((0, 0), (0, lpad - num_labels)))
    return {
        "w0": params["w0"].astype(jnp.bfloat16),
        "b0": params["b0"].astype(jnp.float32),
        "w1": params["w1"].astype(jnp.bfloat16),
        "b1": params["b1"].astype(jnp.float32),
        "w2": w2.astype(jnp.bfloat16),
        "b2": b2.astype(jnp.float32),
        "num_labels": num_labels,          # static python int
    }


def _bf16_elementwise_default():
    # v6e / v7x have native bf16 VPU/EUP; older parts (v5e, ...) do not.
    try:
        kind = jax.devices()[0].device_kind.lower()
    except Exception:
        return False
    return ("v6" in kind) or ("v7" in kind)


def roberta_classification_head(features, prepped, *, batch_tile=256,
                                bf16_elementwise=None):
    """features: (B, S, H).  prepped: output of prepare_head_params()."""
    if bf16_elementwise is None:
        bf16_elementwise = _bf16_elementwise_default()

    w0, b0 = prepped["w0"], prepped["b0"]
    w1, b1 = prepped["w1"], prepped["b1"]
    w2, b2 = prepped["w2"], prepped["b2"]
    num_labels = prepped["num_labels"]

    B = features.shape[0]
    H = w0.shape[0]
    H2 = w1.shape[1]
    LPAD = w2.shape[1]

    # Batch tiling: TB is a multiple of 8 (sublane).  Aim for >= 2 tiles
    # whenever B allows it, so the parallel grid axis can shard across v7x's
    # two TensorCores and the x-tile double buffer has work to overlap.
    B8 = _round_up(B, 8)
    if B8 <= batch_tile:
        TB = max(8, _round_up((B8 + 1) // 2, 8)) if B8 >= 16 else B8
    else:
        TB = batch_tile
    B_pad = _round_up(B8, TB)
    n_tiles = B_pad // TB

    # CLS slice + bf16 cast + pad collapsed into one producer (no f32 detour).
    x = features[:, 0, :].astype(jnp.bfloat16)
    if B_pad != B:
        x = jnp.pad(x, ((0, B_pad - B), (0, 0)))

    # Resident (constant index_map) operands: single-buffered -- they never
    # change across grid steps, so a second pipeline buffer is wasted VMEM.
    def resident(shape):
        return pl.BlockSpec(shape, lambda i: (0, 0),
                            pipeline_mode=pl.Buffered(buffer_count=1))

    cost = pl.CostEstimate(
        flops=2 * B_pad * (H * H + H * H2 + H2 * LPAD),
        transcendentals=B_pad * (H + H2),
        bytes_accessed=(x.size * 2                       # bf16 activations in
                        + (w0.size + w1.size + w2.size) * 2
                        + (b0.size + b1.size + b2.size) * 4
                        + B_pad * LPAD * 4),             # f32 out
    )

    kernel = functools.partial(_head_kernel, bf16_elementwise=bf16_elementwise)

    out = pl.pallas_call(
        kernel,
        out_shape=jax.ShapeDtypeStruct((B_pad, LPAD), jnp.float32),
        grid=(n_tiles,),
        in_specs=[
            pl.BlockSpec((TB, H), lambda i: (i, 0)),     # activation stream
            resident((H, H)),                            # w0 (VMEM-resident)
            resident((1, H)),                            # b0
            resident((H, H2)),                           # w1
            resident((1, H2)),                           # b1
            resident((H2, LPAD)),                        # w2 (lane-padded)
            resident((1, LPAD)),                         # b2
        ],
        out_specs=pl.BlockSpec((TB, LPAD), lambda i: (i, 0)),
        compiler_params=pltpu.CompilerParams(
            dimension_semantics=(
                ("parallel",) if n_tiles >= 2 else ("arbitrary",))),
        cost_estimate=cost,
    )(x, w0, b0, w1, b1, w2, b2)

    # TODO(synk): output could be emitted as bf16 to halve the writeback; kept
    # f32 so downstream logit consumers see full precision.
    return out[:B, :num_labels]


def init_params(key, hidden_size, num_labels):
    """Deterministic synthetic init; Linear weights stored as (in, out), f32."""
    k = jax.random.split(key, 6)
    scale = 0.02
    return {
        "w0": scale * jax.random.normal(k[0], (hidden_size, hidden_size), jnp.float32),
        "b0": scale * jax.random.normal(k[1], (1, hidden_size), jnp.float32),
        "w1": scale * jax.random.normal(k[2], (hidden_size, 256), jnp.float32),
        "b1": scale * jax.random.normal(k[3], (1, 256), jnp.float32),
        "w2": scale * jax.random.normal(k[4], (256, num_labels), jnp.float32),
        "b2": scale * jax.random.normal(k[5], (1, num_labels), jnp.float32),
    }


def _reference(features, params):
    """Pure-JAX f32 reference of the PyTorch forward (eval-mode dropout)."""
    x = features[:, 0, :]
    x = jnp.tanh(x @ params["w0"] + params["b0"])
    x = jnp.tanh(x @ params["w1"] + params["b1"])
    return x @ params["w2"] + params["b2"]


if __name__ == "__main__":
    key = jax.random.PRNGKey(0)
    k_feat, k_param = jax.random.split(key)

    batch, seq, hidden, num_labels = 2, 8, 32, 8
    features = jax.random.normal(k_feat, (batch, seq, hidden), jnp.float32)
    params = init_params(k_param, hidden, num_labels)

    # One-time weight prep (bf16 cast + lane padding) -- outside the hot path.
    prepped = prepare_head_params(params)

    out = jax.block_until_ready(roberta_classification_head(features, prepped))

    ref = _reference(features, params)
    assert out.shape == (batch, num_labels)
    # bf16 MXU (+ bf16 tanh on v6e/v7x) vs f32 reference -> loosened tolerance.
    assert jnp.allclose(out, ref, atol=2e-3, rtol=2e-2)

    print("KERNEL_OK")
</pallas_src>

<mosaic_0001>
module attributes {stable_mosaic.version = 11 : i64} {
  func.func @_head_kernel(%arg0: i32, %arg1: memref<8x32xbf16, #tpu.memory_space<vmem>>, %arg2: memref<32x32xbf16, #tpu.memory_space<vmem>>, %arg3: memref<1x32xf32, #tpu.memory_space<vmem>>, %arg4: memref<32x256xbf16, #tpu.memory_space<vmem>>, %arg5: memref<1x256xf32, #tpu.memory_space<vmem>>, %arg6: memref<256x128xbf16, #tpu.memory_space<vmem>>, %arg7: memref<1x128xf32, #tpu.memory_space<vmem>>, %arg8: memref<8x128xf32, #tpu.memory_space<vmem>>) attributes {dimension_semantics = [#tpu.dimension_semantics<arbitrary>], iteration_bounds = array<i64: 1>, scalar_prefetch = 0 : i64, scratch_operands = 0 : i64, tpu.core_type = #tpu.core_type<tc>, window_params = [{transform_indices = @transform_0, window_bounds = array<i64: 8, 32>}, {pipeline_mode = #tpu.pipeline_mode<synchronous>, transform_indices = @transform_1, window_bounds = array<i64: 32, 32>}, {pipeline_mode = #tpu.pipeline_mode<synchronous>, transform_indices = @transform_2, window_bounds = array<i64: 1, 32>}, {pipeline_mode = #tpu.pipeline_mode<synchronous>, transform_indices = @transform_3, window_bounds = array<i64: 32, 256>}, {pipeline_mode = #tpu.pipeline_mode<synchronous>, transform_indices = @transform_4, window_bounds = array<i64: 1, 256>}, {pipeline_mode = #tpu.pipeline_mode<synchronous>, transform_indices = @transform_5, window_bounds = array<i64: 256, 128>}, {pipeline_mode = #tpu.pipeline_mode<synchronous>, transform_indices = @transform_6, window_bounds = array<i64: 1, 128>}, {transform_indices = @transform_7, window_bounds = array<i64: 8, 128>}]} {
    %c0 = arith.constant 0 : index
    %c0_0 = arith.constant 0 : index
    %0 = vector.load %arg1[%c0, %c0_0] : memref<8x32xbf16, #tpu.memory_space<vmem>>, vector<8x32xbf16>
    %c0_1 = arith.constant 0 : index
    %c0_2 = arith.constant 0 : index
    %1 = vector.load %arg2[%c0_1, %c0_2] : memref<32x32xbf16, #tpu.memory_space<vmem>>, vector<32x32xbf16>
    %cst = arith.constant dense<0.000000e+00> : vector<8x32xf32>
    %2 = tpu.matmul %0, %1, %cst {dimension_numbers = #tpu.dot_dimension_numbers<[1], [0], [0], [1], [0, 0, 1, 1], [], []>} : vector<8x32xbf16>, vector<32x32xbf16>, vector<8x32xf32> -> vector<8x32xf32>
    %c0_3 = arith.constant 0 : index
    %c0_4 = arith.constant 0 : index
    %3 = vector.load %arg3[%c0_3, %c0_4] : memref<1x32xf32, #tpu.memory_space<vmem>>, vector<1x32xf32>
    %4 = vector.broadcast %3 : vector<1x32xf32> to vector<8x32xf32>
    %5 = arith.addf %2, %4 : vector<8x32xf32>
    %6 = math.tanh %5 : vector<8x32xf32>
    %7 = arith.truncf %6 : vector<8x32xf32> to vector<8x32xbf16>
    %c0_5 = arith.constant 0 : index
    %c0_6 = arith.constant 0 : index
    %8 = vector.load %arg4[%c0_5, %c0_6] : memref<32x256xbf16, #tpu.memory_space<vmem>>, vector<32x256xbf16>
    %cst_7 = arith.constant dense<0.000000e+00> : vector<8x256xf32>
    %9 = tpu.matmul %7, %8, %cst_7 {dimension_numbers = #tpu.dot_dimension_numbers<[1], [0], [0], [1], [0, 0, 1, 1], [], []>} : vector<8x32xbf16>, vector<32x256xbf16>, vector<8x256xf32> -> vector<8x256xf32>
    %c0_8 = arith.constant 0 : index
    %c0_9 = arith.constant 0 : index
    %10 = vector.load %arg5[%c0_8, %c0_9] : memref<1x256xf32, #tpu.memory_space<vmem>>, vector<1x256xf32>
    %11 = vector.broadcast %10 : vector<1x256xf32> to vector<8x256xf32>
    %12 = arith.addf %9, %11 : vector<8x256xf32>
    %13 = math.tanh %12 : vector<8x256xf32>
    %14 = arith.truncf %13 : vector<8x256xf32> to vector<8x256xbf16>
    %c0_10 = arith.constant 0 : index
    %c0_11 = arith.constant 0 : index
    %15 = vector.load %arg6[%c0_10, %c0_11] : memref<256x128xbf16, #tpu.memory_space<vmem>>, vector<256x128xbf16>
    %cst_12 = arith.constant dense<0.000000e+00> : vector<8x128xf32>
    %16 = tpu.matmul %14, %15, %cst_12 {dimension_numbers = #tpu.dot_dimension_numbers<[1], [0], [0], [1], [0, 0, 1, 1], [], []>} : vector<8x256xbf16>, vector<256x128xbf16>, vector<8x128xf32> -> vector<8x128xf32>
    %c0_13 = arith.constant 0 : index
    %c0_14 = arith.constant 0 : index
    %17 = vector.load %arg7[%c0_13, %c0_14] : memref<1x128xf32, #tpu.memory_space<vmem>>, vector<1x128xf32>
    %18 = vector.broadcast %17 : vector<1x128xf32> to vector<8x128xf32>
    %19 = arith.addf %16, %18 : vector<8x128xf32>
    %c0_15 = arith.constant 0 : index
    %c0_16 = arith.constant 0 : index
    %20 = vector.load %arg8[%c0_15, %c0_16] : memref<8x128xf32, #tpu.memory_space<vmem>>, vector<8x128xf32>
    tpu.vector_store %arg8[%c0_15, %c0_16], %19 {strides = array<i32>} : memref<8x128xf32, #tpu.memory_space<vmem>>, vector<8x128xf32>,
    return
  }
  func.func @transform_0(%arg0: i32) -> (i32, i32) {
    %c0_i32 = arith.constant 0 : i32
    %c0_i32_0 = arith.constant 0 : i32
    return %arg0, %c0_i32 : i32, i32
  }
  func.func @transform_1(%arg0: i32) -> (i32, i32) {
    %c0_i32 = arith.constant 0 : i32
    %c0_i32_0 = arith.constant 0 : i32
    %c0_i32_1 = arith.constant 0 : i32
    return %c0_i32, %c0_i32_0 : i32, i32
  }
  func.func @transform_2(%arg0: i32) -> (i32, i32) {
    %c0_i32 = arith.constant 0 : i32
    %c0_i32_0 = arith.constant 0 : i32
    %c0_i32_1 = arith.constant 0 : i32
    return %c0_i32, %c0_i32_0 : i32, i32
  }
  func.func @transform_3(%arg0: i32) -> (i32, i32) {
    %c0_i32 = arith.constant 0 : i32
    %c0_i32_0 = arith.constant 0 : i32
    %c0_i32_1 = arith.constant 0 : i32
    return %c0_i32, %c0_i32_0 : i32, i32
  }
  func.func @transform_4(%arg0: i32) -> (i32, i32) {
    %c0_i32 = arith.constant 0 : i32
    %c0_i32_0 = arith.constant 0 : i32
    %c0_i32_1 = arith.constant 0 : i32
    return %c0_i32, %c0_i32_0 : i32, i32
  }
  func.func @transform_5(%arg0: i32) -> (i32, i32) {
    %c0_i32 = arith.constant 0 : i32
    %c0_i32_0 = arith.constant 0 : i32
    %c0_i32_1 = arith.constant 0 : i32
    return %c0_i32, %c0_i32_0 : i32, i32
  }
  func.func @transform_6(%arg0: i32) -> (i32, i32) {
    %c0_i32 = arith.constant 0 : i32
    %c0_i32_0 = arith.constant 0 : i32
    %c0_i32_1 = arith.constant 0 : i32
    return %c0_i32, %c0_i32_0 : i32, i32
  }
  func.func @transform_7(%arg0: i32) -> (i32, i32) {
    %c0_i32 = arith.constant 0 : i32
    %c0_i32_0 = arith.constant 0 : i32
    return %arg0, %c0_i32 : i32, i32
  }
}

</mosaic_0001>

<bundles_post_ra>
// kernel: tpu_custom_call.1
= control target key start
LH: loop header
LB: loop body
LE: loop exit
PB: predicated region body
PF: predicated region fallthrough
CT: control target
= control target key end

     0   :  { %12 = vsyncpa [#allocation3], 0  ;;  %s704_s0 = inlined_call_operand.hbm [shape: bf16[8,32], index: 0, kind: input, shape index: {}]   ;;  %s705_s1 = inlined_call_operand.hbm [shape: bf16[32,32], index: 1, kind: input, shape index: {}]   ;;  %s706_s2 = inlined_call_operand.vmem [shape: f32[1,32], index: 2, kind: input, shape index: {}]   ;;  %s707_s3 = inlined_call_operand.hbm [shape: bf16[32,256], index: 3, kind: input, shape index: {}]   ;;  %s708_s4 = inlined_call_operand.vmem [shape: f32[1,256], index: 4, kind: input, shape index: {}]   ;;  %s709_s5 = inlined_call_operand.hbm [shape: bf16[256,128], index: 5, kind: input, shape index: {}]   ;;  %s710_s6 = inlined_call_operand.vmem [shape: f32[1,128], index: 6, kind: input, shape index: {}]   ;;  %s711_s7 = inlined_call_operand.hbm [shape: f32[8,128], index: 7, kind: output, shape index: {}]  }
   0x1   :  { %13 = vsyncpa [#allocation6], 0 }
   0x2   :  { %14 = vsyncpa [#allocation9], 0  ;;  %s31_s26 = sshll.u32 %s705_s1, 4  ;;  %s32_s26 = int_to_ptr.hbm [resolvable:$true] %s31_s26 }
   0x3   :  { %15 = vsyncpa [#allocation4], 0  ;;  %s628_s27 = smov [#allocation5]   ;;  %s21_s8 = sshll.u32 %s704_s0, 4  ;;  %s22_s8 = int_to_ptr.hbm [resolvable:$true] %s21_s8 }
   0x4   :  { %s33_s28 = sshll.u32 %s628_s27, 4  ;;  %s629_s9 = smov 64   ;;  %s34_s28 = int_to_ptr.vmem [resolvable:$true] %s33_s28 }
   0x5   :  { %s630_s10 = smov 4   ;;  %s631_s11 = smov [#allocation2]  }
   0x6   :  { %39 = dma.hbm_to_vmem [thread:$0]  %s32_s26, 256, %s34_s28, [#allocation6], %s629_s9, %s629_s9, %s630_s10  }
   0x7   :  { %s23_s12 = sshll.u32 %s631_s11, 4  ;;  %s46_s15 = sshll.u32 %s707_s3, 4  ;;  %s24_s12 = int_to_ptr.vmem [resolvable:$true] %s23_s12  ;;  %s47_s15 = int_to_ptr.hbm [resolvable:$true] %s46_s15 }
   0x8   :  { %26 = dma.hbm_to_vmem [thread:$0]  %s22_s8, 64, %s24_s12, [#allocation3]  }
   0x9   :  { %s632_s1 = smov [#allocation7]   ;;  %s61_s0 = sshll.u32 %s709_s5, 4  ;;  %s62_s0 = int_to_ptr.hbm [resolvable:$true] %s61_s0 }
   0xa   :  { %s48_s16 = sshll.u32 %s632_s1, 4  ;;  %s633_s19 = smov 128   ;;  %s49_s16 = int_to_ptr.vmem [resolvable:$true] %s48_s16 }
   0xb   :  { %s634_s20 = smov 8   ;;  %s635_s21 = smov [#allocation8]  }
   0xc   :  { %54 = dma.hbm_to_vmem [thread:$0]  %s47_s15, 512, %s49_s16, [#allocation6], %s633_s19, %s633_s19, %s634_s20  }
   0xd   :  { %s63_s22 = sshll.u32 %s635_s21, 4  ;;  %s64_s22 = int_to_ptr.vmem [resolvable:$true] %s63_s22 }
   0xe   :  { %69 = dma.hbm_to_vmem [thread:$0]  %s62_s0, 2048, %s64_s22, [#allocation9], %s629_s9, %s629_s9, %s630_s10  }
   0xf   :  { %620 = dma.done.wait [#allocation3], 64  }
  0x10   :  { %621 = vsyncadd [#allocation3], 4294967232 }
  0x11   :  { %622 = dma.done.wait [#allocation6], 768  }
  0x12   :  { %623 = vsyncadd [#allocation6], 4294966528 }
  0x13   :  { %624 = dma.done.wait [#allocation9], 2048  }
  0x14   :  { %625 = vsyncadd [#allocation9], 4294965248  ;;  %v462_v0 = vld [vmem:[#allocation5 + $0x8] sm:$0xff]  ;;  %v389_v1 = vld [vmem:[#allocation7 + $0x10] sm:$0xf]  ;;  %vm110_vm0 = vcmask 261120  }
  0x15   :  { %v466_v2 = vld [vmem:[#allocation7 + $0x14] sm:$0xf0]  ;;  %120 = vmatpush.bf16.msra.mxu1 %v462_v0  ;;  %v461_v3 = vld [vmem:[#allocation5] sm:$0xff]  ;;  %v89_v5 = vld [vmem:[#allocation2] sm:$0xf]  ;;  %s358_s29 = sshll.u32 %s711_s7, 4  ;;  %s359_s29 = int_to_ptr.hbm [resolvable:$true] %s358_s29 }
  0x16   :  { %v390_v4 = vor.u32 %v466_v2, %v389_v1  ;;  %v465_v6 = vld [vmem:[#allocation7 + $0x14] sm:$0xf]  ;;  %v391_v7 = vld [vmem:[#allocation7 + $0x18] sm:$0xf0]  ;;  %v381_v9 = vld [vmem:[#allocation7] sm:$0xf] }
  0x17   :  { %v394_v8 = vor.u32 %v465_v6, %v391_v7  ;;  %v464_v10 = vld [vmem:[#allocation7 + $0x4] sm:$0xf0]  ;;  %v463_v11 = vld [vmem:[#allocation7 + $0x4] sm:$0xf]  ;;  %v383_v13 = vld [vmem:[#allocation7 + $0x8] sm:$0xf0] }
  0x18   :  { %v382_v12 = vor.u32 %v464_v10, %v381_v9  ;;  %v386_v14 = vor.u32 %v463_v11, %v383_v13  ;;  %v474_v15 = vld [vmem:[#allocation8 + $0x38] sm:$0xff]  ;;  %v473_v17 = vld [vmem:[#allocation8 + $0x30] sm:$0xff]  ;;  %v472_v19 = vld [vmem:[#allocation8 + $0x28] sm:$0xff] }
  0x19   :  { %121 = vmatpush.bf16.msra.mxu1 %v461_v3  ;;  %181 = vmatpush.bf16.msra.mxu2 %v394_v8  ;;  %v482_v16 = vld [vmem:[#allocation8 + $0x78] sm:$0xff]  ;;  %v481_v18 = vld [vmem:[#allocation8 + $0x70] sm:$0xff]  ;;  %v480_v20 = vld [vmem:[#allocation8 + $0x68] sm:$0xff] }
  0x1a   :  { %324 = vmatpush.bf16.msra.mxu3 %v474_v15  ;;  %337 = vmatpush.bf16.msra.mxu0 %v482_v16  ;;  %v471_v21 = vld [vmem:[#allocation8 + $0x20] sm:$0xff]  ;;  %v470_v23 = vld [vmem:[#allocation8 + $0x18] sm:$0xff]  ;;  %v492_v24 = vld [vmem:[%s706_s2] ss:$0 sm:$0xff] }
  0x1b   :  { %v479_v22 = vld [vmem:[#allocation8 + $0x60] sm:$0xff]  ;;  %v469_v30 = vld [vmem:[#allocation8 + $0x10] sm:$0xff]  ;;  %v478_v31 = vld [vmem:[#allocation8 + $0x58] sm:$0xff] }
  0x1c   :  { %378 = vmatmul.msk.bf16.vlgmr.msra.gmra.mxu1 %vm110_vm0, %v89_v5  ;;  %v468_v32 = vld [vmem:[#allocation8 + $0x8] sm:$0xff]  ;;  %v477_v33 = vld [vmem:[#allocation8 + $0x50] sm:$0xff]  ;;  %v467_v34 = vld [vmem:[#allocation8] sm:$0xff] }
  0x1d   :  { %168 = vmatpush.bf16.msrb.mxu1 %v390_v4  ;;  %182 = vmatpush.bf16.msra.mxu2 %v386_v14  ;;  %v476_v35 = vld [vmem:[#allocation8 + $0x48] sm:$0xff]  ;;  %v475_v36 = vld [vmem:[#allocation8 + $0x40] sm:$0xff] }
  0x1e   :  { %325 = vmatpush.bf16.msra.mxu3 %v473_v17  ;;  %338 = vmatpush.bf16.msra.mxu0 %v481_v18  ;;  %v133_v37 = vld [vmem:[%s708_s4] sm:$0x3]  ;;  %s636_s4 = smov [#allocation10]  }
  0x1f   :  { %v135_v38 = vperm.slane %v133_v37, 0  ;;  %v136_v41 = vperm.slane %v133_v37, 1  ;;  %v493_v50 = vld [vmem:[%s710_s6] ss:$0 sm:$0xff]  ;;  %s356_s26 = sshll.u32 %s636_s4, 4  ;;  %s357_s26 = int_to_ptr.vmem [resolvable:$true] %s356_s26 }
  0x21   :  { %169 = vmatpush.bf16.msrb.mxu1 %v382_v12 }
  0x22   :  { %326 = vmatpush.bf16.msra.mxu3 %v472_v19  ;;  %339 = vmatpush.bf16.msra.mxu0 %v480_v20 }
  0x26   :  { %327 = vmatpush.bf16.msra.mxu3 %v471_v21  ;;  %340 = vmatpush.bf16.msra.mxu0 %v479_v22 }
  0x2a   :  { %328 = vmatpush.bf16.msra.mxu3 %v470_v23  ;;  %341 = vmatpush.bf16.msra.mxu0 %v478_v31 }
  0x2e   :  { %329 = vmatpush.bf16.msra.mxu3 %v469_v30  ;;  %342 = vmatpush.bf16.msra.mxu0 %v477_v33 }
  0x32   :  { %330 = vmatpush.bf16.msra.mxu3 %v468_v32  ;;  %343 = vmatpush.bf16.msra.mxu0 %v476_v35 }
  0x36   :  { %331 = vmatpush.bf16.msra.mxu3 %v467_v34  ;;  %344 = vmatpush.bf16.msra.mxu0 %v475_v36 }
  0x99   :  { %v123_v25 = vpop.f32.mrf.mxu1 }
  0x9a   :  { %v124_v26 = vadd.f32 %v492_v24, %v123_v25 }
  0x9c   :  { %494 = vtanh.f32 %v124_v26 }
  0xa1   :  { %v125_v27 = vpop.f32.mrf.mxu1 }
  0xa2   :  { %v495_v28 = vpop.eup %494 }
  0xa3   :  { %v128_v29 = vpack.c.bf16 %v495_v28, %v495_v28 }
  0xa5   :  { %395 = vmatmul.msk.bf16.vlgmr.msrb.gmra.mxu1 %vm110_vm0, %v128_v29  ;;  %396 = vmatmul.msk.bf16.vlgmr.msra.gmra.mxu2 %vm110_vm0, %v128_v29 }
 0x122   :  { %v171_v39 = vpop.f32.mrf.mxu1 }
 0x123   :  { %v172_v40 = vadd.f32 %v171_v39, %v135_v38 }
 0x125   :  { %496 = vtanh.f32 %v172_v40 }
 0x128   :  { %v184_v42 = vpop.f32.mrf.mxu2 }
 0x129   :  { %v185_v43 = vadd.f32 %v184_v42, %v136_v41 }
 0x12a   :  { %v173_v44 = vpop.f32.mrf.mxu1 }
 0x12b   :  { %v497_v45 = vpop.eup %496  ;;  %498 = vtanh.f32 %v185_v43 }
 0x12c   :  { %v190_v46 = vpack.c.bf16 %v497_v45, %v497_v45 }
 0x12e   :  { %332 = vmatmul.bf16.vlgmr.msra.gmra.mxu3 %v190_v46 }
 0x130   :  { %v186_v47 = vpop.f32.mrf.mxu2 }
 0x131   :  { %v499_v48 = vpop.eup %498 }
 0x132   :  { %v191_v49 = vpack.c.bf16 %v499_v48, %v499_v48 }
 0x134   :  { %345 = vmatmul.bf16.vlgmr.msra.gmra.mxu0 %v191_v49 }
 0x1b1   :  { %v333_v51 = vpop.f32.mrf.mxu3  ;;  %v346_v52 = vpop.f32.mrf.mxu0 }
 0x1b2   :  { %v334_v53 = vadd.f32 %v493_v50, %v333_v51 }
 0x1b4   :  { %v347_v54 = vadd.f32 %v346_v52, %v334_v53 }
 0x1b6   :  { %350 = vst [vmem:[#allocation10] sm:$0xff] %v347_v54 }
 0x1b7   :  { %361 = dma.vmem_to_hbm [thread:$0]  %s357_s26, 128, %s359_s29, [#allocation4]  }
 0x1b9   :  { %v335_v55 = vpop.f32.mrf.mxu3  ;;  %v348_v56 = vpop.f32.mrf.mxu0 }
 0x1ba   :  { %626 = dma.done.wait [#allocation4], 128  }
 0x1bb   :  { %627 = vsyncadd [#allocation4], 4294967168 }
 0x1bc   :  { %366 = vsyncpa [#allocation3], 1 }
 0x1bd   :  { %367 = vsyncpa [#allocation6], 1 }
 0x1be   :  { %368 = vsyncpa [#allocation9], 1 }
 0x1bf   :  { %369 = vsyncpa [#allocation4], 1 }

</bundles_post_ra>
